<compile_context>
chip_gen: v7x
topology: tpu7x:2x2x1
jax: 0.10.0
libtpu: 0.0.40
codegen_flags: <defaults>
</compile_context>

<pallas_src>
import functools

import jax
import jax.numpy as jnp
from jax import lax
from jax.experimental import pallas as pl
from jax.experimental.pallas import tpu as pltpu


_ROW_CHUNK = 8        # query rows per inner iteration (= one f32 sublane group)
_UNROLL_LIMIT = 32    # fully unroll the pop loop when nsample*dilation <= this


def _make_knn_pool_kernel(nsample: int, dilation: int, reduction: str,
                          n_src: int, c: int, tm: int, idx_bits: int):
    """Build the per-tile kernel (all hyper-params are static Python values)."""
    k_total = nsample * dilation
    rc = _ROW_CHUNK
    n_chunks = tm // rc
    # Plain Python ints (NOT jnp arrays) so the kernel does not capture constants.
    keep_mask = -(1 << idx_bits)        # clears the low idx_bits (index) bits
    int_max = (1 << 31) - 1             # sentinel for already-popped columns
    inv_nsample = 1.0 / float(nsample)
    n_pops = (nsample - 1) * dilation + 1   # last kept rank is the final pop needed

    def pop(keys, *, last):
        """Pop the current nearest column per row -> (bool one-hot, keys')."""
        kmin = jnp.min(keys, axis=-1, keepdims=True)    # ONE cross-lane reduction
        onehot = keys == kmin                           # exactly one True per row
        if last:                                        # dead-update skip
            return onehot, keys
        return onehot, jnp.where(onehot, int_max, keys)

    def unrolled_picks(keys):
        """All nsample dilated picks (bool one-hots) with the pop loop unrolled."""
        picks = []
        for t in range(n_pops):
            onehot, keys = pop(keys, last=(t == n_pops - 1))
            if t % dilation == 0:
                picks.append(onehot)
        return picks

    def chunk_keys(q_ref, st_rows, row0):
        """Packed (distance, index) int32 keys for one rc-row query chunk."""
        q = q_ref[pl.ds(row0, rc), :].astype(jnp.float32)     # [rc, 3]
        sx, sy, sz = st_rows                                   # each [1, N]
        dx = q[:, 0:1] - sx                                    # [rc,1]-[1,N] -> [rc,N]
        dy = q[:, 1:2] - sy
        dz = q[:, 2:3] - sz
        d = dx * dx + dy * dy + dz * dz                        # [rc, N], non-negative
        col = lax.broadcasted_iota(jnp.int32, (rc, n_src), 1)
        # Non-negative f32 bit patterns order like int32; the low idx_bits
        # mantissa bits are replaced by the column index, so a single min is an
        # argmin with lowest-index tie-break (matches stable argsort).
        return (lax.bitcast_convert_type(d, jnp.int32) & keep_mask) | col

    def load_st_rows(st_ref):
        return (st_ref[0:1, :].astype(jnp.float32),
                st_ref[1:2, :].astype(jnp.float32),
                st_ref[2:3, :].astype(jnp.float32))

    if reduction == 'max':

        def kernel(q_ref, st_ref, f_ref, o_ref):
            st_rows = load_st_rows(st_ref)

            def chunk_body(r, carry):
                row0 = pl.multiple_of(r * rc, rc)
                keys = chunk_keys(q_ref, st_rows, row0)
                f = f_ref[...].astype(jnp.float32)
                if k_total <= _UNROLL_LIMIT:
                    picks = unrolled_picks(keys)
                    # Stack the chunk's one-hots and gather with ONE matmul,
                    # then max-reduce the nsample groups (no per-pick matmul
                    # serialization through the maximum dependency).
                    sel = jnp.concatenate(
                        [p.astype(jnp.float32) for p in picks], axis=0)  # [nsample*rc, N]
                    g = jnp.dot(sel, f, preferred_element_type=jnp.float32)
                    acc = g[0:rc, :]
                    for s in range(1, nsample):
                        acc = jnp.maximum(acc, g[s * rc:(s + 1) * rc, :])
                else:
                    # Large k: bound live ranges with fori_loop over nsample.
                    acc0 = jnp.full((rc, c), -jnp.inf, jnp.float32)

                    def body(_, kc):
                        keys_i, acc_i = kc
                        for j in range(dilation):           # small static inner loop
                            onehot, keys_i = pop(keys_i, last=False)
                            if j == 0:
                                g = jnp.dot(onehot.astype(jnp.float32), f,
                                            preferred_element_type=jnp.float32)
                                acc_i = jnp.maximum(acc_i, g)
                        return keys_i, acc_i

                    acc = lax.fori_loop(0, nsample, body, (keys, acc0), unroll=2)[1]
                o_ref[pl.ds(row0, rc), :] = acc.astype(o_ref.dtype)
                return carry

            lax.fori_loop(0, n_chunks, chunk_body, 0)

        return kernel

    # 'sum' / 'mean': accumulate the [tm, N] selection matrix in VMEM scratch,
    # then run ONE fused gather matmul S @ feat after the chunk loop.
    def kernel(q_ref, st_ref, f_ref, o_ref, sel_ref):
        st_rows = load_st_rows(st_ref)

        def chunk_body(r, carry):
            row0 = pl.multiple_of(r * rc, rc)
            keys = chunk_keys(q_ref, st_rows, row0)
            if k_total <= _UNROLL_LIMIT:
                picks = unrolled_picks(keys)
                sel = picks[0].astype(jnp.float32)
                for p in picks[1:]:
                    sel = sel + p.astype(jnp.float32)
            else:
                sel0 = jnp.zeros((rc, n_src), jnp.float32)

                def body(_, kc):
                    keys_i, sel_i = kc
                    for j in range(dilation):
                        onehot, keys_i = pop(keys_i, last=False)
                        if j == 0:
                            sel_i = sel_i + onehot.astype(jnp.float32)
                    return keys_i, sel_i

                sel = lax.fori_loop(0, nsample, body, (keys, sel0), unroll=2)[1]
            sel_ref[pl.ds(row0, rc), :] = sel
            return carry

        lax.fori_loop(0, n_chunks, chunk_body, 0)

        acc = jnp.dot(sel_ref[...], f_ref[...].astype(jnp.float32),
                      preferred_element_type=jnp.float32)
        if reduction == 'mean':
            acc = acc * inv_nsample
        o_ref[...] = acc.astype(o_ref.dtype)

    return kernel


def _grid_invariant_spec(block_shape, index_map):
    """BlockSpec for blocks that never change across the grid: single-buffer them."""
    try:
        return pl.BlockSpec(block_shape, index_map, pipeline_mode=pl.Buffered(1))
    except TypeError:   # very old jax without pipeline_mode: fall back to default
        return pl.BlockSpec(block_shape, index_map)


@functools.partial(jax.jit, static_argnames=('nsample', 'dilation', 'reduction', 'tm'))
def knn_pooling(p_q, p_s, feat_s, *, nsample, dilation, reduction='max', tm=128):
    """KnnPooling forward: KNN-group source features around query points, then pool."""
    assert reduction in ('sum', 'max', 'mean')
    m = p_q.shape[0]
    n, c = feat_s.shape
    assert p_s.shape == (n, 3) and p_q.shape[1] == 3
    # Degenerate k > N would silently re-select points (the reference would not).
    assert nsample * dilation <= n, "nsample * dilation must be <= #source points"

    # Tile selection: one big tile amortizes per-step overhead; no artificial
    # grid split for megacore (M=256/tm=128 already yields 2 parallel steps).
    tm = min(tm, m)
    assert m % tm == 0 and tm % _ROW_CHUNK == 0, \
        "M must tile by a multiple-of-8 tile size"   # TODO(synk): pad ragged M.

    idx_bits = max(1, int(n - 1).bit_length())
    kernel = _make_knn_pool_kernel(nsample, dilation, reduction, n, c, tm, idx_bits)

    p_s_t = p_s.T                                   # [3, N] -> VPU-only distances

    # ---- VMEM budget with lane(128)/sublane(8) padding ----------------------
    def pad(x, mult):
        return ((x + mult - 1) // mult) * mult

    f32 = 4
    bytes_q   = 2 * pad(tm, 8) * pad(3, 128) * f32   # double-buffered query tile
    bytes_st  = 1 * pad(3, 8) * pad(n, 128) * f32    # single-buffered (grid-invariant)
    bytes_f   = 1 * pad(n, 8) * pad(c, 128) * f32    # single-buffered (grid-invariant)
    bytes_out = 2 * pad(tm, 8) * pad(c, 128) * f32   # double-buffered output tile
    bytes_sel = (pad(tm, 8) * pad(n, 128) * f32) if reduction != 'max' else 0
    slack = 4 << 20                                  # chunk temps + compiler scratch
    vmem_bytes = bytes_q + bytes_st + bytes_f + bytes_out + bytes_sel + slack

    try:
        vmem_cap = int(pltpu.get_tpu_info().vmem_capacity_bytes)
    except Exception:      # e.g. interpret mode / no TPU visible: assume smallest (v7x)
        vmem_cap = 64 << 20
    vmem_limit = int(min(max(vmem_bytes, 32 << 20), int(vmem_cap * 0.8)))
    if vmem_bytes > vmem_limit:
        raise ValueError(
            f"knn_pooling VMEM footprint ~{vmem_bytes >> 20} MiB exceeds the "
            f"{vmem_limit >> 20} MiB budget for this TPU generation; reduce N*C "
            "or stream the source points in N-chunks.")

    scratch_shapes = ()
    if reduction != 'max':
        scratch_shapes = (pltpu.VMEM((tm, n), jnp.float32),)   # selection matrix

    return pl.pallas_call(
        kernel,
        out_shape=jax.ShapeDtypeStruct((m, c), feat_s.dtype),
        grid_spec=pltpu.PrefetchScalarGridSpec(
            num_scalar_prefetch=0,
            grid=(m // tm,),
            in_specs=[
                pl.BlockSpec((tm, 3), lambda i: (i, 0)),          # query coord tile
                _grid_invariant_spec((3, n), lambda i: (0, 0)),   # all source coords^T
                _grid_invariant_spec((n, c), lambda i: (0, 0)),   # all source feats
            ],
            out_specs=pl.BlockSpec((tm, c), lambda i: (i, 0)),
            scratch_shapes=scratch_shapes,
        ),
        compiler_params=pltpu.CompilerParams(
            dimension_semantics=("parallel",),
            vmem_limit_bytes=vmem_limit,
        ),
    )(p_q, p_s_t, feat_s)


def _reference_knn_pooling(p_q, p_s, feat_s, nsample, dilation, reduction):
    """Pure-JAX reference mirroring the PyTorch module's semantics."""
    d = jnp.sum((p_q[:, None, :] - p_s[None, :, :]) ** 2, axis=-1)    # [M, N]
    order = jnp.argsort(d, axis=-1, stable=True)       # ascending, ties -> lowest idx
    idx = order[:, : nsample * dilation : dilation]    # dilated ranks
    grouped = feat_s[idx]                              # [M, nsample, C]
    if reduction == 'max':
        return jnp.max(grouped, axis=1)
    if reduction == 'mean':
        return jnp.mean(grouped, axis=1)
    return jnp.sum(grouped, axis=1)


if __name__ == "__main__":
    key = jax.random.PRNGKey(0)
    k1, k2, k3 = jax.random.split(key, 3)

    M, N, C = 256, 512, 64            # queries / source points / channels
    nsample, dilation = 4, 2

    # Coarse-grid coordinates (multiples of 0.25): squared distances are exact
    # multiples of 1/16 and below 2^8, so the packed-key distance quantization
    # is exact and exact ties are broken identically (lowest index) by both the
    # kernel and the reference.
    p_s = jax.random.randint(k1, (N, 3), 0, 32).astype(jnp.float32) * 0.25
    p_q = jax.random.randint(k2, (M, 3), 0, 32).astype(jnp.float32) * 0.25
    feat_s = jax.random.normal(k3, (N, C), dtype=jnp.float32)

    for reduction in ('max', 'mean', 'sum'):
        out = knn_pooling(p_q, p_s, feat_s,
                          nsample=nsample, dilation=dilation, reduction=reduction)
        out = jax.block_until_ready(out)
        ref = _reference_knn_pooling(p_q, p_s, feat_s, nsample, dilation, reduction)
        assert out.shape == (M, C)
        assert jnp.allclose(out, ref, atol=1e-4, rtol=1e-4), f"mismatch ({reduction})"

    print("KERNEL_OK")
</pallas_src>

<mosaic_0001>
module attributes {stable_mosaic.version = 11 : i64} {
  func.func @kernel(%arg0: i32, %arg1: memref<128x3xf32, #tpu.memory_space<vmem>>, %arg2: memref<3x512xf32, #tpu.memory_space<vmem>>, %arg3: memref<512x64xf32, #tpu.memory_space<vmem>>, %arg4: memref<128x64xf32, #tpu.memory_space<vmem>>) attributes {dimension_semantics = [#tpu.dimension_semantics<parallel>], iteration_bounds = array<i64: 2>, scalar_prefetch = 0 : i64, scratch_operands = 0 : i64, tpu.core_type = #tpu.core_type<tc>, window_params = [{transform_indices = @transform_0, window_bounds = array<i64: 128, 3>}, {pipeline_mode = #tpu.pipeline_mode<synchronous>, transform_indices = @transform_1, window_bounds = array<i64: 3, 512>}, {pipeline_mode = #tpu.pipeline_mode<synchronous>, transform_indices = @transform_2, window_bounds = array<i64: 512, 64>}, {transform_indices = @transform_3, window_bounds = array<i64: 128, 64>}]} {
    %c0 = arith.constant 0 : index
    %c0_0 = arith.constant 0 : index
    %0 = vector.load %arg2[%c0, %c0_0] : memref<3x512xf32, #tpu.memory_space<vmem>>, vector<1x512xf32>
    %c1 = arith.constant 1 : index
    %c0_1 = arith.constant 0 : index
    %1 = vector.load %arg2[%c1, %c0_1] : memref<3x512xf32, #tpu.memory_space<vmem>>, vector<1x512xf32>
    %c2 = arith.constant 2 : index
    %c0_2 = arith.constant 0 : index
    %2 = vector.load %arg2[%c2, %c0_2] : memref<3x512xf32, #tpu.memory_space<vmem>>, vector<1x512xf32>
    %c0_i32 = arith.constant 0 : i32
    %c16_i32 = arith.constant 16 : i32
    %3 = arith.addi %c0_i32, %c16_i32 : i32
    %c1_i32 = arith.constant 1 : i32
    scf.for %arg5 = %c0_i32 to %3 step %c1_i32  : i32 {
      %c8_i32 = arith.constant 8 : i32
      %4 = arith.muli %arg5, %c8_i32 : i32
      %5 = tpu.assume_multiple %4, 8 : i32
      %6 = arith.index_cast %5 : i32 to index
      %c0_4 = arith.constant 0 : index
      %7 = vector.load %arg1[%6, %c0_4] : memref<128x3xf32, #tpu.memory_space<vmem>>, vector<8x3xf32>
      %8 = vector.extract_strided_slice %7 {offsets = [0, 0], sizes = [8, 1], strides = [1, 1]} : vector<8x3xf32> to vector<8x1xf32>
      %9 = vector.broadcast %8 : vector<8x1xf32> to vector<8x512xf32>
      %10 = vector.broadcast %0 : vector<1x512xf32> to vector<8x512xf32>
      %11 = arith.subf %9, %10 : vector<8x512xf32>
      %12 = vector.extract_strided_slice %7 {offsets = [0, 1], sizes = [8, 1], strides = [1, 1]} : vector<8x3xf32> to vector<8x1xf32>
      %13 = vector.broadcast %12 : vector<8x1xf32> to vector<8x512xf32>
      %14 = vector.broadcast %1 : vector<1x512xf32> to vector<8x512xf32>
      %15 = arith.subf %13, %14 : vector<8x512xf32>
      %16 = vector.extract_strided_slice %7 {offsets = [0, 2], sizes = [8, 1], strides = [1, 1]} : vector<8x3xf32> to vector<8x1xf32>
      %17 = vector.broadcast %16 : vector<8x1xf32> to vector<8x512xf32>
      %18 = vector.broadcast %2 : vector<1x512xf32> to vector<8x512xf32>
      %19 = arith.subf %17, %18 : vector<8x512xf32>
      %20 = arith.mulf %11, %11 : vector<8x512xf32>
      %21 = arith.mulf %15, %15 : vector<8x512xf32>
      %22 = arith.addf %20, %21 : vector<8x512xf32>
      %23 = arith.mulf %19, %19 : vector<8x512xf32>
      %24 = arith.addf %22, %23 : vector<8x512xf32>
      %25 = tpu.iota {dimensions = array<i32: 1>} : vector<8x512xi32>
      %26 = tpu.bitcast %24 : vector<8x512xf32> -> vector<8x512xi32>
      %c-512_i32 = arith.constant -512 : i32
      %27 = vector.broadcast %c-512_i32 : i32 to vector<8x512xi32>
      %28 = arith.andi %26, %27 : vector<8x512xi32>
      %29 = arith.ori %28, %25 : vector<8x512xi32>
      %c0_5 = arith.constant 0 : index
      %c0_6 = arith.constant 0 : index
      %30 = vector.load %arg3[%c0_5, %c0_6] : memref<512x64xf32, #tpu.memory_space<vmem>>, vector<512x64xf32>
      %cst = arith.constant dense<2147483647> : vector<8xi32>
      %31 = vector.multi_reduction <minsi>, %29, %cst [1] : vector<8x512xi32> to vector<8xi32>
      %32 = vector.shape_cast %31 : vector<8xi32> to vector<8x1xi32>
      %33 = vector.broadcast %32 : vector<8x1xi32> to vector<8x512xi32>
      %34 = arith.cmpi eq, %29, %33 : vector<8x512xi32>
      %c2147483647_i32 = arith.constant 2147483647 : i32
      %35 = vector.broadcast %c2147483647_i32 : i32 to vector<8x512xi32>
      %36 = arith.select %34, %35, %29 : vector<8x512xi1>, vector<8x512xi32>
      %cst_7 = arith.constant dense<2147483647> : vector<8xi32>
      %37 = vector.multi_reduction <minsi>, %36, %cst_7 [1] : vector<8x512xi32> to vector<8xi32>
      %38 = vector.shape_cast %37 : vector<8xi32> to vector<8x1xi32>
      %39 = vector.broadcast %38 : vector<8x1xi32> to vector<8x512xi32>
      %40 = arith.cmpi eq, %36, %39 : vector<8x512xi32>
      %c2147483647_i32_8 = arith.constant 2147483647 : i32
      %41 = vector.broadcast %c2147483647_i32_8 : i32 to vector<8x512xi32>
      %42 = arith.select %40, %41, %36 : vector<8x512xi1>, vector<8x512xi32>
      %cst_9 = arith.constant dense<2147483647> : vector<8xi32>
      %43 = vector.multi_reduction <minsi>, %42, %cst_9 [1] : vector<8x512xi32> to vector<8xi32>
      %44 = vector.shape_cast %43 : vector<8xi32> to vector<8x1xi32>
      %45 = vector.broadcast %44 : vector<8x1xi32> to vector<8x512xi32>
      %46 = arith.cmpi eq, %42, %45 : vector<8x512xi32>
      %c2147483647_i32_10 = arith.constant 2147483647 : i32
      %47 = vector.broadcast %c2147483647_i32_10 : i32 to vector<8x512xi32>
      %48 = arith.select %46, %47, %42 : vector<8x512xi1>, vector<8x512xi32>
      %cst_11 = arith.constant dense<2147483647> : vector<8xi32>
      %49 = vector.multi_reduction <minsi>, %48, %cst_11 [1] : vector<8x512xi32> to vector<8xi32>
      %50 = vector.shape_cast %49 : vector<8xi32> to vector<8x1xi32>
      %51 = vector.broadcast %50 : vector<8x1xi32> to vector<8x512xi32>
      %52 = arith.cmpi eq, %48, %51 : vector<8x512xi32>
      %c2147483647_i32_12 = arith.constant 2147483647 : i32
      %53 = vector.broadcast %c2147483647_i32_12 : i32 to vector<8x512xi32>
      %54 = arith.select %52, %53, %48 : vector<8x512xi1>, vector<8x512xi32>
      %cst_13 = arith.constant dense<2147483647> : vector<8xi32>
      %55 = vector.multi_reduction <minsi>, %54, %cst_13 [1] : vector<8x512xi32> to vector<8xi32>
      %56 = vector.shape_cast %55 : vector<8xi32> to vector<8x1xi32>
      %57 = vector.broadcast %56 : vector<8x1xi32> to vector<8x512xi32>
      %58 = arith.cmpi eq, %54, %57 : vector<8x512xi32>
      %c2147483647_i32_14 = arith.constant 2147483647 : i32
      %59 = vector.broadcast %c2147483647_i32_14 : i32 to vector<8x512xi32>
      %60 = arith.select %58, %59, %54 : vector<8x512xi1>, vector<8x512xi32>
      %cst_15 = arith.constant dense<2147483647> : vector<8xi32>
      %61 = vector.multi_reduction <minsi>, %60, %cst_15 [1] : vector<8x512xi32> to vector<8xi32>
      %62 = vector.shape_cast %61 : vector<8xi32> to vector<8x1xi32>
      %63 = vector.broadcast %62 : vector<8x1xi32> to vector<8x512xi32>
      %64 = arith.cmpi eq, %60, %63 : vector<8x512xi32>
      %c2147483647_i32_16 = arith.constant 2147483647 : i32
      %65 = vector.broadcast %c2147483647_i32_16 : i32 to vector<8x512xi32>
      %66 = arith.select %64, %65, %60 : vector<8x512xi1>, vector<8x512xi32>
      %cst_17 = arith.constant dense<2147483647> : vector<8xi32>
      %67 = vector.multi_reduction <minsi>, %66, %cst_17 [1] : vector<8x512xi32> to vector<8xi32>
      %68 = vector.shape_cast %67 : vector<8xi32> to vector<8x1xi32>
      %69 = vector.broadcast %68 : vector<8x1xi32> to vector<8x512xi32>
      %70 = arith.cmpi eq, %66, %69 : vector<8x512xi32>
      %71 = arith.extui %34 : vector<8x512xi1> to vector<8x512xi32>
      %72 = arith.sitofp %71 : vector<8x512xi32> to vector<8x512xf32>
      %73 = arith.extui %46 : vector<8x512xi1> to vector<8x512xi32>
      %74 = arith.sitofp %73 : vector<8x512xi32> to vector<8x512xf32>
      %75 = arith.extui %58 : vector<8x512xi1> to vector<8x512xi32>
      %76 = arith.sitofp %75 : vector<8x512xi32> to vector<8x512xf32>
      %77 = arith.extui %70 : vector<8x512xi1> to vector<8x512xi32>
      %78 = arith.sitofp %77 : vector<8x512xi32> to vector<8x512xf32>
      %79 = tpu.concatenate %72, %74, %76, %78 in 0 : vector<8x512xf32>, vector<8x512xf32>, vector<8x512xf32>, vector<8x512xf32> -> vector<32x512xf32>
      %cst_18 = arith.constant dense<0.000000e+00> : vector<32x64xf32>
      %80 = tpu.matmul %79, %30, %cst_18 {dimension_numbers = #tpu.dot_dimension_numbers<[1], [0], [0], [1], [0, 0, 1, 1], [], []>} : vector<32x512xf32>, vector<512x64xf32>, vector<32x64xf32> -> vector<32x64xf32>
      %81 = vector.extract_strided_slice %80 {offsets = [0, 0], sizes = [8, 64], strides = [1, 1]} : vector<32x64xf32> to vector<8x64xf32>
      %82 = vector.extract_strided_slice %80 {offsets = [8, 0], sizes = [8, 64], strides = [1, 1]} : vector<32x64xf32> to vector<8x64xf32>
      %83 = arith.maximumf %81, %82 : vector<8x64xf32>
      %84 = vector.extract_strided_slice %80 {offsets = [16, 0], sizes = [8, 64], strides = [1, 1]} : vector<32x64xf32> to vector<8x64xf32>
      %85 = arith.maximumf %83, %84 : vector<8x64xf32>
      %86 = vector.extract_strided_slice %80 {offsets = [24, 0], sizes = [8, 64], strides = [1, 1]} : vector<32x64xf32> to vector<8x64xf32>
      %87 = arith.maximumf %85, %86 : vector<8x64xf32>
      %88 = arith.index_cast %5 : i32 to index
      %c0_19 = arith.constant 0 : index
      %89 = vector.load %arg4[%88, %c0_19] : memref<128x64xf32, #tpu.memory_space<vmem>>, vector<8x64xf32>
      tpu.vector_store %arg4[%88, %c0_19], %87 {strides = array<i32>} : memref<128x64xf32, #tpu.memory_space<vmem>>, vector<8x64xf32>,
    }
    %c16_i32_3 = arith.constant 16 : i32
    return
  }
  func.func @transform_0(%arg0: i32) -> (i32, i32) {
    %c0_i32 = arith.constant 0 : i32
    %c0_i32_0 = arith.constant 0 : i32
    return %arg0, %c0_i32 : i32, i32
  }
  func.func @transform_1(%arg0: i32) -> (i32, i32) {
    %c0_i32 = arith.constant 0 : i32
    %c0_i32_0 = arith.constant 0 : i32
    %c0_i32_1 = arith.constant 0 : i32
    return %c0_i32, %c0_i32_0 : i32, i32
  }
  func.func @transform_2(%arg0: i32) -> (i32, i32) {
    %c0_i32 = arith.constant 0 : i32
    %c0_i32_0 = arith.constant 0 : i32
    %c0_i32_1 = arith.constant 0 : i32
    return %c0_i32, %c0_i32_0 : i32, i32
  }
  func.func @transform_3(%arg0: i32) -> (i32, i32) {
    %c0_i32 = arith.constant 0 : i32
    %c0_i32_0 = arith.constant 0 : i32
    return %arg0, %c0_i32 : i32, i32
  }
}

</mosaic_0001>

<bundles_post_ra>
// kernel: knn_pooling.1
= control target key start
LH: loop header
LB: loop body
LE: loop exit
PB: predicated region body
PF: predicated region fallthrough
CT: control target
= control target key end

     0   :  { %s1104_s12 = smov 0   ;;  %s1416_s0 = inlined_call_operand.vmem [shape: f32[256,3], index: 0, kind: input, shape index: {}]   ;;  %s1417_s1 = inlined_call_operand.vmem [shape: f32[3,512], index: 1, kind: input, shape index: {}]   ;;  %s1418_s2 = inlined_call_operand.vmem [shape: f32[512,64], index: 2, kind: input, shape index: {}]   ;;  %s1419_s3 = inlined_call_operand.vmem [shape: f32[256,64], index: 3, kind: output, shape index: {}]  }
   0x1 LB: > { %s842_s13 = sadd.s32 4294967295, %s1074_s12   ;;  %p846_p0 = scmp.ge.s32.totalorder %s1074_s12, 1  ;;  %s1074_s12 = sphi %s1104_s12, %s13_s12  }
   0x2   : > { %p138_p1 = scmp.lt.s32.totalorder %s1074_s12, 3 }
   0x4   : > { %p139_p2 = pnand %p846_p0, %p138_p1 }
   0x5   : > { %s847_s14 = sshll.u32 (!%p139_p2), %s842_s13, 4  ;;  %v1115_v0 = vld [vmem:[%s1417_s1] ss:$4 sm:$0xf] (!%p139_p2)  ;;  %s1137_s28 = smov (!%p139_p2), 0  }
   0x6   : > { %142 = sbr.rel (%p139_p2) target bundleno = 2490 (0x9ba), region = 32  ;;  %p163_p3 = scmp.lt.s32.totalorder (!%p139_p2), %s847_s14, 31  ;;  %v1120_v1 = vld [vmem:[%s1417_s1 + $0x1] ss:$4 sm:$0xf] (!%p139_p2) }
   0x7   : > { %v1125_v2 = vld [vmem:[%s1417_s1 + $0x2] ss:$4 sm:$0xf] (!%p139_p2) }
   0xd   : > { %s1421_s14 = smov (!%p163_p3, %s847_s14), 31 }
   0xe   : > { %s848_s21 = sshll.u32 %s1421_s14, 3 }
   0xf   : > { %s1130_s24 = scalar_lea.vmem %s1416_s0, %s848_s21  ;;  %s1135_s27 = scalar_lea.vmem %s1419_s3, %s848_s21 }
  0x10 LB: >> { %v1080_v3 = vmov 0   ;;  %v1081_v4 = vmov 2   ;;  %s853_s29 = sshll.u32 %s1078_s28, 3  ;;  %v1082_v6 = vmov 1   ;;  %v194_v7 = vlaneseq  ;;  %s184_s28 = sadd.s32 1, %s1078_s28   ;;  %s1078_s28 = sphi %s1137_s28, %s184_s28  }
  0x11   : >> { %1060 = vset.pattern.permute.xlu0 %v1080_v3  ;;  %1062 = vset.pattern.permute.xlu1 %v1081_v4  ;;  %s186_s30 = scalar_lea.vmem %s1130_s24, %s853_s29  ;;  %s774_s23 = scalar_lea.vmem %s1135_s27, %s853_s29 }
  0x12   : >> { %v187_v5 = vld [vmem:[%s186_s30] sm:$0xff]  ;;  %v195_v8 = vshrl.u32 %v194_v7, 7  ;;  %v297_v35 = vand.u32 127, %v194_v7  ;;  %p181_p4 = scmp.ge.s32.totalorder %s184_s28, 16  }
  0x13   : >> { %190 = vperm.xlu0 %1060, %v187_v5   ;;  %248 = vperm.xlu1 %1062, %v187_v5  }
  0x14   : >> { %v196_v9 = vsub.s32 0, %v195_v8  ;;  %v200_v10 = vsub.s32 1, %v195_v8  ;;  %v204_v11 = vsub.s32 2, %v195_v8  ;;  %v208_v12 = vsub.s32 3, %v195_v8 }
  0x15   : >> { %v298_v57 = vadd.s32 128, %v297_v35  ;;  %v299_v58 = vadd.s32 256, %v297_v35  ;;  %v300_v59 = vadd.s32 384, %v297_v35 }
  0x16   : >> { %v197_v13 = vrot.slane %v1115_v0, %v196_v9  ;;  %v201_v14 = vrot.slane %v1115_v0, %v200_v10  ;;  %v205_v15 = vrot.slane %v1115_v0, %v204_v11  ;;  %v209_v16 = vrot.slane %v1115_v0, %v208_v12 }
  0x17   : >> { %1061 = vset.pattern.permute.xlu0 %v1082_v6  ;;  %v255_v17 = vrot.slane %v1125_v2, %v196_v9  ;;  %v259_v18 = vrot.slane %v1125_v2, %v200_v10  ;;  %v263_v19 = vrot.slane %v1125_v2, %v204_v11  ;;  %v267_v20 = vrot.slane %v1125_v2, %v208_v12 }
  0x18   : >> { %219 = vperm.xlu0 %1061, %v187_v5   ;;  %v226_v27 = vrot.slane %v1120_v1, %v196_v9  ;;  %v230_v28 = vrot.slane %v1120_v1, %v200_v10  ;;  %v234_v29 = vrot.slane %v1120_v1, %v204_v11  ;;  %v238_v30 = vrot.slane %v1120_v1, %v208_v12 }
  0x1c   : >> { %1063 = vset.pattern.permute.xlu0 %v1081_v4 }
  0x92   : >> { %v191_v21 = vpop.permute.xlu0 %190  ;;  %v249_v22 = vpop.permute.xlu1 %248 }
  0x93   : >> { %v214_v23 = vsub.f32 %v191_v21, %v197_v13  ;;  %v215_v24 = vsub.f32 %v191_v21, %v201_v14  ;;  %v216_v25 = vsub.f32 %v191_v21, %v205_v15  ;;  %v217_v26 = vsub.f32 %v191_v21, %v209_v16  ;;  %v329_v16 = vld [vmem:[%s1418_s2 + $0x80] sm:$0xff] }
  0x94   : >> { %v272_v31 = vsub.f32 %v249_v22, %v255_v17  ;;  %v273_v32 = vsub.f32 %v249_v22, %v259_v18  ;;  %v274_v33 = vsub.f32 %v249_v22, %v263_v19  ;;  %v275_v34 = vsub.f32 %v249_v22, %v267_v20  ;;  %v330_v17 = vld [vmem:[%s1418_s2 + $0x88] sm:$0xff]  ;;  %v361_v18 = vld [vmem:[%s1418_s2 + $0x180] sm:$0xff] }
  0x95   : >> { %v276_v36 = vmul.f32 %v214_v23, %v214_v23  ;;  %v277_v37 = vmul.f32 %v215_v24, %v215_v24  ;;  %v278_v38 = vmul.f32 %v216_v25, %v216_v25  ;;  %v279_v39 = vmul.f32 %v217_v26, %v217_v26  ;;  %v362_v20 = vld [vmem:[%s1418_s2 + $0x188] sm:$0xff]  ;;  %v313_v21 = vld [vmem:[%s1418_s2] sm:$0xff] }
  0x96   : >> { %v288_v45 = vmul.f32 %v272_v31, %v272_v31  ;;  %v289_v46 = vmul.f32 %v273_v32, %v273_v32  ;;  %v290_v47 = vmul.f32 %v274_v33, %v274_v33  ;;  %v291_v48 = vmul.f32 %v275_v34, %v275_v34  ;;  %v314_v22 = vld [vmem:[%s1418_s2 + $0x8] sm:$0xff]  ;;  %v345_v25 = vld [vmem:[%s1418_s2 + $0x100] sm:$0xff]  ;;  %v364_v31 = vld [vmem:[%s1418_s2 + $0x198] sm:$0xff] }
  0x97   : >> { %v220_v40 = vpop.permute.xlu0 %219  ;;  %v976_v19 = vpack.c.bf16 %v330_v17, %v329_v16  ;;  %v1008_v23 = vpack.c.bf16 %v362_v20, %v361_v18  ;;  %v978_v24 = vpack.c.bf16 %v314_v22, %v313_v21  ;;  %v346_v26 = vld [vmem:[%s1418_s2 + $0x108] sm:$0xff]  ;;  %v315_v34 = vld [vmem:[%s1418_s2 + $0x10] sm:$0xff]  ;;  %v353_v16 = vld [vmem:[%s1418_s2 + $0x140] sm:$0xff] }
  0x98   : >> { %v243_v41 = vsub.f32 %v220_v40, %v226_v27  ;;  %v244_v42 = vsub.f32 %v220_v40, %v230_v28  ;;  %v245_v43 = vsub.f32 %v220_v40, %v234_v29  ;;  %v246_v44 = vsub.f32 %v220_v40, %v238_v30  ;;  %v331_v27 = vld [vmem:[%s1418_s2 + $0x90] sm:$0xff]  ;;  %v332_v29 = vld [vmem:[%s1418_s2 + $0x98] sm:$0xff]  ;;  %v334_v40 = vld [vmem:[%s1418_s2 + $0xa8] sm:$0xff] }
  0x99   : >> { %977 = vmatprep.subr.bf16.mxu0 %v976_v19  ;;  %v1010_v28 = vpack.c.bf16 %v346_v26, %v345_v25  ;;  %v363_v30 = vld [vmem:[%s1418_s2 + $0x190] sm:$0xff]  ;;  %1009 = vmatprep.subr.bf16.mxu1 %v1008_v23  ;;  %v980_v32 = vpack.c.bf16 %v332_v29, %v331_v27  ;;  %v354_v18 = vld [vmem:[%s1418_s2 + $0x148] sm:$0xff]  ;;  %v340_v20 = vld [vmem:[%s1418_s2 + $0xd8] sm:$0xff] }
  0x9a   : >> { %v280_v49 = vmul.f32 %v243_v41, %v243_v41  ;;  %v281_v50 = vmul.f32 %v244_v42, %v244_v42  ;;  %v282_v51 = vmul.f32 %v245_v43, %v245_v43  ;;  %v283_v52 = vmul.f32 %v246_v44, %v246_v44  ;;  %979 = vmatpush3.bf16.msra.mxu0 %v978_v24  ;;  %v365_v43 = vld [vmem:[%s1418_s2 + $0x1a0] sm:$0xff]  ;;  %v366_v44 = vld [vmem:[%s1418_s2 + $0x1a8] sm:$0xff]  ;;  %v339_v19 = vld [vmem:[%s1418_s2 + $0xd0] sm:$0xff] }
  0x9b   : >> { %v1012_v33 = vpack.c.bf16 %v364_v31, %v363_v30  ;;  %1011 = vmatpush3.bf16.msra.mxu1 %v1010_v28  ;;  %981 = vmatprep.subr.bf16.mxu0 %v980_v32  ;;  %v371_v21 = vld [vmem:[%s1418_s2 + $0x1d0] sm:$0xff]  ;;  %v372_v22 = vld [vmem:[%s1418_s2 + $0x1d8] sm:$0xff]  ;;  %v1026_v24 = vpack.c.bf16 %v354_v18, %v353_v16  ;;  %v996_v25 = vpack.c.bf16 %v340_v20, %v339_v19  ;;  %v341_v31 = vld [vmem:[%s1418_s2 + $0xe0] sm:$0xff] }
  0x9c   : >> { %v284_v53 = vadd.f32 %v280_v49, %v276_v36  ;;  %v285_v54 = vadd.f32 %v281_v50, %v277_v37  ;;  %v286_v55 = vadd.f32 %v282_v51, %v278_v38  ;;  %v287_v56 = vadd.f32 %v283_v52, %v279_v39  ;;  %v347_v36 = vld [vmem:[%s1418_s2 + $0x110] sm:$0xff]  ;;  %v348_v38 = vld [vmem:[%s1418_s2 + $0x118] sm:$0xff]  ;;  %v333_v39 = vld [vmem:[%s1418_s2 + $0xa0] sm:$0xff] }
  0x9d   : >> { %1013 = vmatprep.subr.bf16.mxu1 %v1012_v33  ;;  %v1014_v41 = vpack.c.bf16 %v348_v38, %v347_v36  ;;  %v984_v42 = vpack.c.bf16 %v334_v40, %v333_v39  ;;  %v350_v49 = vld [vmem:[%s1418_s2 + $0x128] sm:$0xff]  ;;  %v335_v51 = vld [vmem:[%s1418_s2 + $0xb0] sm:$0xff]  ;;  %v336_v52 = vld [vmem:[%s1418_s2 + $0xb8] sm:$0xff]  ;;  %v1028_v29 = vpack.c.bf16 %v372_v22, %v371_v21 }
  0x9e   : >> { %v292_v60 = vadd.f32 %v288_v45, %v284_v53  ;;  %v293_v61 = vadd.f32 %v289_v46, %v285_v54  ;;  %v294_v62 = vadd.f32 %v290_v47, %v286_v55  ;;  %v295_v63 = vadd.f32 %v291_v48, %v287_v56  ;;  %v317_v45 = vld [vmem:[%s1418_s2 + $0x20] sm:$0xff]  ;;  %v318_v47 = vld [vmem:[%s1418_s2 + $0x28] sm:$0xff]  ;;  %v367_v53 = vld [vmem:[%s1418_s2 + $0x1b0] sm:$0xff] }
  0x9f   : >> { %v1016_v46 = vpack.c.bf16 %v366_v44, %v365_v43  ;;  %v349_v48 = vld [vmem:[%s1418_s2 + $0x120] sm:$0xff]  ;;  %v986_v50 = vpack.c.bf16 %v318_v47, %v317_v45  ;;  %1015 = vmatpush3.bf16.msra.mxu1 %v1014_v41  ;;  %v988_v55 = vpack.c.bf16 %v336_v52, %v335_v51  ;;  %v368_v56 = vld [vmem:[%s1418_s2 + $0x1b8] sm:$0xff]  ;;  %v323_v26 = vld [vmem:[%s1418_s2 + $0x50] sm:$0xff] }
  0xa0   : >> { %v305_v3 = vand.u32 4294966784, %v292_v60  ;;  %v306_v4 = vand.u32 4294966784, %v293_v61  ;;  %v307_v5 = vand.u32 4294966784, %v294_v62  ;;  %v308_v6 = vand.u32 4294966784, %v295_v63  ;;  %v351_v60 = vld [vmem:[%s1418_s2 + $0x130] sm:$0xff]  ;;  %v352_v61 = vld [vmem:[%s1418_s2 + $0x138] sm:$0xff] }
  0xa1   : >> { %v1018_v54 = vpack.c.bf16 %v350_v49, %v349_v48  ;;  %1017 = vmatprep.subr.bf16.mxu1 %v1016_v46  ;;  %v337_v62 = vld [vmem:[%s1418_s2 + $0xc0] sm:$0xff]  ;;  %v338_v63 = vld [vmem:[%s1418_s2 + $0xc8] sm:$0xff]  ;;  %v324_v27 = vld [vmem:[%s1418_s2 + $0x58] sm:$0xff] }
  0xa2   : >> { %v1158_v7 = vor.u32 %v305_v3, %v297_v35  ;;  %v1160_v8 = vor.u32 %v306_v4, %v298_v57  ;;  %v1162_v9 = vor.u32 %v307_v5, %v299_v58  ;;  %v1164_v10 = vor.u32 %v308_v6, %v300_v59  ;;  %v316_v35 = vld [vmem:[%s1418_s2 + $0x18] sm:$0xff]  ;;  %v319_v57 = vld [vmem:[%s1418_s2 + $0x30] sm:$0xff]  ;;  %v369_v3 = vld [vmem:[%s1418_s2 + $0x1c0] sm:$0xff] }
  0xa3   : >> { %v982_v37 = vpack.c.bf16 %v316_v35, %v315_v34  ;;  %v320_v58 = vld [vmem:[%s1418_s2 + $0x38] sm:$0xff]  ;;  %v1020_v59 = vpack.c.bf16 %v368_v56, %v367_v53  ;;  %v370_v4 = vld [vmem:[%s1418_s2 + $0x1c8] sm:$0xff]  ;;  %1019 = vmatpush3.bf16.msra.mxu1 %v1018_v54  ;;  %v1022_v6 = vpack.c.bf16 %v352_v61, %v351_v60  ;;  %v355_v28 = vld [vmem:[%s1418_s2 + $0x150] sm:$0xff]  ;;  %v998_v35 = vpack.c.bf16 %v324_v27, %v323_v26 }
  0xa4   : >> { %vm377_vm0 = vcmp.lt.s32.totalorder %v1158_v7, %v1160_v8  ;;  %vm379_vm1 = vcmp.lt.s32.totalorder %v1162_v9, %v1164_v10  ;;  %v990_v5 = vpack.c.bf16 %v320_v58, %v319_v57  ;;  %v1024_v17 = vpack.c.bf16 %v370_v4, %v369_v3  ;;  %v356_v30 = vld [vmem:[%s1418_s2 + $0x158] sm:$0xff]  ;;  %v342_v32 = vld [vmem:[%s1418_s2 + $0xe8] sm:$0xff]  ;;  %v373_v33 = vld [vmem:[%s1418_s2 + $0x1e0] sm:$0xff] }
  0xa5   : >> { %v378_v11 = vsel %vm377_vm0, %v1158_v7, %v1160_v8  ;;  %v380_v12 = vsel %vm379_vm1, %v1162_v9, %v1164_v10  ;;  %983 = vmatpush3.bf16.msra.mxu0 %v982_v37  ;;  %1021 = vmatprep.subr.bf16.mxu1 %v1020_v59  ;;  %v374_v34 = vld [vmem:[%s1418_s2 + $0x1e8] sm:$0xff]  ;;  %v1030_v36 = vpack.c.bf16 %v356_v30, %v355_v28  ;;  %v325_v38 = vld [vmem:[%s1418_s2 + $0x60] sm:$0xff]  ;;  %v343_v49 = vld [vmem:[%s1418_s2 + $0xf0] sm:$0xff]  ;;  %v1083_v4 = vmov 1.0  }
  0xa6   : >> { %vm381_vm2 = vcmp.lt.s32.totalorder %v378_v11, %v380_v12  ;;  %985 = vmatprep.subr.bf16.mxu0 %v984_v42  ;;  %v1000_v37 = vpack.c.bf16 %v342_v32, %v341_v31  ;;  %v326_v39 = vld [vmem:[%s1418_s2 + $0x68] sm:$0xff]  ;;  %v1032_v40 = vpack.c.bf16 %v374_v34, %v373_v33  ;;  %v357_v41 = vld [vmem:[%s1418_s2 + $0x160] sm:$0xff]  ;;  %v375_v51 = vld [vmem:[%s1418_s2 + $0x1f0] sm:$0xff] }
  0xa7   : >> { %v1174_v13 = vsel %vm381_vm2, %v378_v11, %v380_v12  ;;  %v992_v11 = vpack.c.bf16 %v338_v63, %v337_v62  ;;  %v321_v12 = vld [vmem:[%s1418_s2 + $0x40] sm:$0xff]  ;;  %1023 = vmatpush3.bf16.msra.mxu1 %v1022_v6  ;;  %v358_v42 = vld [vmem:[%s1418_s2 + $0x168] sm:$0xff]  ;;  %v1002_v43 = vpack.c.bf16 %v326_v39, %v325_v38  ;;  %v328_v53 = vld [vmem:[%s1418_s2 + $0x78] sm:$0xff] }
  0xa8   : >> { %v384_v14 = vshra.s32 %v1174_v13, 16  ;;  %1025 = vmatprep.subr.bf16.mxu1 %v1024_v17  ;;  %v1034_v44 = vpack.c.bf16 %v358_v42, %v357_v41  ;;  %v383_v45 = vand.u32 65535, %v1174_v13  ;;  %v376_v13 = vld [vmem:[%s1418_s2 + $0x1f8] sm:$0xff]  ;;  %v359_v56 = vld [vmem:[%s1418_s2 + $0x170] sm:$0xff] }
  0xa9   : >> { %987 = vmatpush3.bf16.msra.mxu0 %v986_v50  ;;  %v344_v50 = vld [vmem:[%s1418_s2 + $0xf8] sm:$0xff]  ;;  %v1036_v54 = vpack.c.bf16 %v376_v13, %v375_v51 }
  0xaa   : >> { %v1177_v15 = vcvt.s32.f32 %v384_v14  ;;  %989 = vmatprep.subr.bf16.mxu0 %v988_v55  ;;  %v322_v14 = vld [vmem:[%s1418_s2 + $0x48] sm:$0xff]  ;;  %v385_v47 = vcvt.s32.f32 %v383_v45  ;;  %v1004_v52 = vpack.c.bf16 %v344_v50, %v343_v49  ;;  %v360_v57 = vld [vmem:[%s1418_s2 + $0x178] sm:$0xff] }
  0xab   : >> { %v994_v23 = vpack.c.bf16 %v322_v14, %v321_v12  ;;  %1027 = vmatpush3.bf16.msra.mxu1 %v1026_v24  ;;  %v1038_v58 = vpack.c.bf16 %v360_v57, %v359_v56 }
  0xac   : >> { %387 = vmin.xlane.f32.xlu1 %v1177_v15  ;;  %1029 = vmatprep.subr.bf16.mxu1 %v1028_v29 }
  0xad   : >> { %991 = vmatpush3.bf16.msra.mxu0 %v990_v5 }
  0xae   : >> { %993 = vmatprep.subr.bf16.mxu0 %v992_v11 }
  0xaf   : >> { %1031 = vmatpush3.bf16.msra.mxu1 %v1030_v36 }
  0xb0   : >> { %1033 = vmatprep.subr.bf16.mxu1 %v1032_v40 }
  0xb1   : >> { %995 = vmatpush3.bf16.msra.mxu0 %v994_v23 }
  0xb2   : >> { %997 = vmatprep.subr.bf16.mxu0 %v996_v25 }
  0xb3   : >> { %1035 = vmatpush3.bf16.msra.mxu1 %v1034_v44 }
  0xb4   : >> { %1037 = vmatprep.subr.bf16.mxu1 %v1036_v54 }
  0xb5   : >> { %999 = vmatpush3.bf16.msra.mxu0 %v998_v35 }
  0xb6   : >> { %1001 = vmatprep.subr.bf16.mxu0 %v1000_v37 }
  0xb7   : >> { %1039 = vmatpush3.bf16.msra.mxu1 %v1038_v58 }
  0xb9   : >> { %1003 = vmatpush3.bf16.msra.mxu0 %v1002_v43 }
  0xba   : >> { %1005 = vmatprep.subr.bf16.mxu0 %v1004_v52 }
 0x139   : >> { %v388_v46 = vpop.xlane.xlu1 %387 }
 0x13a   : >> { %vm389_vm3 = vcmp.eq.f32.partialorder %v1177_v15, %v388_v46  ;;  %v327_v15 = vld [vmem:[%s1418_s2 + $0x70] sm:$0xff]  ;;  %v394_v59 = vcvt.f32.s32 %v388_v46 }
 0x13b   : >> { %v390_v48 = vsel %vm389_vm3, %v385_v47, inf  ;;  %v1006_v55 = vpack.c.bf16 %v328_v53, %v327_v15 }
 0x13c   : >> { %391 = vmin.xlane.f32.xlu0 %v390_v48  ;;  %v395_v61 = vshll.u32 %v394_v59, 16 }
 0x13d   : >> { %1007 = vmatpush3.bf16.msra.mxu0 %v1006_v55 }
 0x1c9   : >> { %v392_v60 = vpop.xlane.xlu0 %391 }
 0x1ca   : >> { %v393_v62 = vcvt.f32.s32 %v392_v60 }
 0x1cc   : >> { %v396_v63 = vadd.s32 %v395_v61, %v393_v62 }
 0x1ce   : >> { %vm398_vm4 = vcmp.eq.s32.totalorder %v1160_v8, %v396_v63  ;;  %vm400_vm5 = vcmp.eq.s32.totalorder %v1164_v10, %v396_v63  ;;  %vm397_vm6 = vcmp.eq.s32.totalorder %v1158_v7, %v396_v63  ;;  %vm399_vm7 = vcmp.eq.s32.totalorder %v1162_v9, %v396_v63 }
 0x1cf   : >> { %v402_v3 = vsel %vm398_vm4, 2147483647, %v1160_v8  ;;  %870 = vmatprep.mubr.msk.f32.mxu0 %vm398_vm4, %v1083_v4  ;;  %v404_v5 = vsel %vm400_vm5, 2147483647, %v1164_v10  ;;  %878 = vmatprep.mubr.msk.f32.mxu1 %vm400_vm5, %v1083_v4  ;;  %v401_v6 = vsel %vm397_vm6, 2147483647, %v1158_v7 }
 0x1d0   : >> { %871 = vmatmul.mubr.msk.f32.vlgmr.msra.gmra.mrb[0].mxu0 %vm397_vm6, %v1083_v4  ;;  %v403_v11 = vsel %vm399_vm7, 2147483647, %v1162_v9  ;;  %879 = vmatmul.mubr.msk.f32.vlgmr.msra.gmra.mrb[0].mxu1 %vm399_vm7, %v1083_v4  ;;  %vm405_vm8 = vcmp.lt.s32.totalorder %v401_v6, %v402_v3 }
 0x1d1   : >> { %v406_v12 = vsel %vm405_vm8, %v401_v6, %v402_v3  ;;  %vm407_vm9 = vcmp.lt.s32.totalorder %v403_v11, %v404_v5 }
 0x1d2   : >> { %v408_v14 = vsel %vm407_vm9, %v403_v11, %v404_v5 }
 0x1d3   : >> { %vm409_vm10 = vcmp.lt.s32.totalorder %v406_v12, %v408_v14 }
 0x1d4   : >> { %v410_v8 = vsel %vm409_vm10, %v406_v12, %v408_v14 }
 0x1d5   : >> { %v412_v16 = vshra.s32 %v410_v8, 16  ;;  %v411_v10 = vand.u32 65535, %v410_v8 }
 0x1d7   : >> { %v414_v17 = vcvt.s32.f32 %v412_v16  ;;  %v413_v19 = vcvt.s32.f32 %v411_v10 }
 0x1d9   : >> { %415 = vmin.xlane.f32.xlu1 %v414_v17 }
 0x266   : >> { %v416_v18 = vpop.xlane.xlu1 %415 }
 0x267   : >> { %vm417_vm11 = vcmp.eq.f32.partialorder %v414_v17, %v416_v18  ;;  %v422_v26 = vcvt.f32.s32 %v416_v18 }
 0x268   : >> { %v418_v7 = vsel %vm417_vm11, %v413_v19, inf }
 0x269   : >> { %419 = vmin.xlane.f32.xlu0 %v418_v7  ;;  %v423_v28 = vshll.u32 %v422_v26, 16 }
 0x2a3   : >> { %v920_v20 = vpop.f32.mrb[0].mxu0  ;;  %v964_v21 = vpop.f32.mrb[0].mxu1 }
 0x2a4   : >> { %v921_v9 = vpop.f32.mrb[1].mxu0  ;;  %v965_v22 = vpop.f32.mrb[1].mxu1 }
 0x2a5   : >> { %v922_v23 = vadd.f32 %v921_v9, %v920_v20  ;;  %v966_v24 = vadd.f32 %v965_v22, %v964_v21 }
 0x2a7   : >> { %v1386_v25 = vadd.f32 %v966_v24, %v922_v23 }
 0x2f6   : >> { %v420_v27 = vpop.xlane.xlu0 %419 }
 0x2f7   : >> { %v421_v29 = vcvt.f32.s32 %v420_v27 }
 0x2f9   : >> { %v424_v30 = vadd.s32 %v423_v28, %v421_v29 }
 0x2fb   : >> { %vm425_vm12 = vcmp.eq.s32.totalorder %v401_v6, %v424_v30  ;;  %vm426_vm13 = vcmp.eq.s32.totalorder %v402_v3, %v424_v30  ;;  %vm427_vm14 = vcmp.eq.s32.totalorder %v403_v11, %v424_v30  ;;  %vm428_vm15 = vcmp.eq.s32.totalorder %v404_v5, %v424_v30 }
 0x2fc   : >> { %v429_v31 = vsel %vm425_vm12, 2147483647, %v401_v6  ;;  %v430_v32 = vsel %vm426_vm13, 2147483647, %v402_v3  ;;  %v431_v33 = vsel %vm427_vm14, 2147483647, %v403_v11 }
 0x2fd   : >> { %v432_v34 = vsel %vm428_vm15, 2147483647, %v404_v5  ;;  %vm433_vm0 = vcmp.lt.s32.totalorder %v429_v31, %v430_v32 }
 0x2fe   : >> { %v434_v35 = vsel %vm433_vm0, %v429_v31, %v430_v32  ;;  %vm435_vm1 = vcmp.lt.s32.totalorder %v431_v33, %v432_v34 }
 0x2ff   : >> { %v436_v36 = vsel %vm435_vm1, %v431_v33, %v432_v34 }
 0x300   : >> { %vm437_vm2 = vcmp.lt.s32.totalorder %v434_v35, %v436_v36 }
 0x301   : >> { %v438_v37 = vsel %vm437_vm2, %v434_v35, %v436_v36 }
 0x302   : >> { %v440_v38 = vshra.s32 %v438_v37, 16  ;;  %v439_v40 = vand.u32 65535, %v438_v37 }
 0x304   : >> { %v442_v39 = vcvt.s32.f32 %v440_v38  ;;  %v441_v42 = vcvt.s32.f32 %v439_v40 }
 0x306   : >> { %443 = vmin.xlane.f32.xlu1 %v442_v39 }
 0x393   : >> { %v444_v41 = vpop.xlane.xlu1 %443 }
 0x394   : >> { %vm445_vm3 = vcmp.eq.f32.partialorder %v442_v39, %v444_v41  ;;  %v450_v44 = vcvt.f32.s32 %v444_v41 }
 0x395   : >> { %v446_v43 = vsel %vm445_vm3, %v441_v42, inf }
 0x396   : >> { %447 = vmin.xlane.f32.xlu0 %v446_v43  ;;  %v451_v46 = vshll.u32 %v450_v44, 16 }
 0x423   : >> { %v448_v45 = vpop.xlane.xlu0 %447 }
 0x424   : >> { %v449_v47 = vcvt.f32.s32 %v448_v45 }
 0x426   : >> { %v452_v48 = vadd.s32 %v451_v46, %v449_v47 }
 0x428   : >> { %vm454_vm4 = vcmp.eq.s32.totalorder %v430_v32, %v452_v48  ;;  %vm456_vm5 = vcmp.eq.s32.totalorder %v432_v34, %v452_v48  ;;  %vm453_vm6 = vcmp.eq.s32.totalorder %v429_v31, %v452_v48  ;;  %vm455_vm7 = vcmp.eq.s32.totalorder %v431_v33, %v452_v48 }
 0x429   : >> { %v458_v49 = vsel %vm454_vm4, 2147483647, %v430_v32  ;;  %872 = vmatprep.mubr.msk.f32.mxu0 %vm454_vm4, %v1083_v4  ;;  %v460_v50 = vsel %vm456_vm5, 2147483647, %v432_v34  ;;  %880 = vmatprep.mubr.msk.f32.mxu1 %vm456_vm5, %v1083_v4  ;;  %v457_v51 = vsel %vm453_vm6, 2147483647, %v429_v31 }
 0x42a   : >> { %873 = vmatmul.mubr.msk.f32.gmra.mrb[2].mxu0 %vm453_vm6, %v1083_v4  ;;  %v459_v52 = vsel %vm455_vm7, 2147483647, %v431_v33  ;;  %881 = vmatmul.mubr.msk.f32.gmra.mrb[2].mxu1 %vm455_vm7, %v1083_v4  ;;  %vm461_vm8 = vcmp.lt.s32.totalorder %v457_v51, %v458_v49 }
 0x42b   : >> { %v462_v13 = vsel %vm461_vm8, %v457_v51, %v458_v49  ;;  %vm463_vm9 = vcmp.lt.s32.totalorder %v459_v52, %v460_v50 }
 0x42c   : >> { %v464_v15 = vsel %vm463_vm9, %v459_v52, %v460_v50 }
 0x42d   : >> { %vm465_vm10 = vcmp.lt.s32.totalorder %v462_v13, %v464_v15 }
 0x42e   : >> { %v466_v53 = vsel %vm465_vm10, %v462_v13, %v464_v15 }
 0x42f   : >> { %v468_v54 = vshra.s32 %v466_v53, 16  ;;  %v467_v56 = vand.u32 65535, %v466_v53 }
 0x431   : >> { %v470_v55 = vcvt.s32.f32 %v468_v54  ;;  %v469_v58 = vcvt.s32.f32 %v467_v56 }
 0x433   : >> { %471 = vmin.xlane.f32.xlu1 %v470_v55 }
 0x4c0   : >> { %v472_v57 = vpop.xlane.xlu1 %471 }
 0x4c1   : >> { %vm473_vm11 = vcmp.eq.f32.partialorder %v470_v55, %v472_v57  ;;  %v478_v12 = vcvt.f32.s32 %v472_v57 }
 0x4c2   : >> { %v474_v59 = vsel %vm473_vm11, %v469_v58, inf }
 0x4c3   : >> { %475 = vmin.xlane.f32.xlu0 %v474_v59  ;;  %v479_v8 = vshll.u32 %v478_v12, 16 }
 0x4fd   : >> { %v923_v60 = vpop.f32.mrb[2].mxu0  ;;  %v967_v61 = vpop.f32.mrb[2].mxu1 }
 0x4fe   : >> { %v924_v62 = vpop.f32.mrb[3].mxu0  ;;  %v968_v63 = vpop.f32.mrb[3].mxu1 }
 0x4ff   : >> { %v925_v3 = vadd.f32 %v924_v62, %v923_v60  ;;  %v969_v5 = vadd.f32 %v968_v63, %v967_v61 }
 0x501   : >> { %v1392_v6 = vadd.f32 %v969_v5, %v925_v3 }
 0x503   : >> { %v771_v11 = vmax.f32 %v1386_v25, %v1392_v6 }
 0x550   : >> { %v476_v14 = vpop.xlane.xlu0 %475 }
 0x551   : >> { %v477_v16 = vcvt.f32.s32 %v476_v14 }
 0x553   : >> { %v480_v17 = vadd.s32 %v479_v8, %v477_v16 }
 0x555   : >> { %vm481_vm12 = vcmp.eq.s32.totalorder %v457_v51, %v480_v17  ;;  %vm482_vm13 = vcmp.eq.s32.totalorder %v458_v49, %v480_v17  ;;  %vm483_vm14 = vcmp.eq.s32.totalorder %v459_v52, %v480_v17  ;;  %vm484_vm15 = vcmp.eq.s32.totalorder %v460_v50, %v480_v17 }
 0x556   : >> { %v485_v10 = vsel %vm481_vm12, 2147483647, %v457_v51  ;;  %v486_v18 = vsel %vm482_vm13, 2147483647, %v458_v49  ;;  %v487_v19 = vsel %vm483_vm14, 2147483647, %v459_v52 }
 0x557   : >> { %v488_v7 = vsel %vm484_vm15, 2147483647, %v460_v50  ;;  %vm489_vm0 = vcmp.lt.s32.totalorder %v485_v10, %v486_v18 }
 0x558   : >> { %v490_v20 = vsel %vm489_vm0, %v485_v10, %v486_v18  ;;  %vm491_vm1 = vcmp.lt.s32.totalorder %v487_v19, %v488_v7 }
 0x559   : >> { %v492_v21 = vsel %vm491_vm1, %v487_v19, %v488_v7 }
 0x55a   : >> { %vm493_vm2 = vcmp.lt.s32.totalorder %v490_v20, %v492_v21 }
 0x55b   : >> { %v494_v9 = vsel %vm493_vm2, %v490_v20, %v492_v21 }
 0x55c   : >> { %v496_v22 = vshra.s32 %v494_v9, 16  ;;  %v495_v24 = vand.u32 65535, %v494_v9 }
 0x55e   : >> { %v498_v23 = vcvt.s32.f32 %v496_v22  ;;  %v497_v27 = vcvt.s32.f32 %v495_v24 }
 0x560   : >> { %499 = vmin.xlane.f32.xlu1 %v498_v23 }
 0x5ed   : >> { %v500_v26 = vpop.xlane.xlu1 %499 }
 0x5ee   : >> { %vm501_vm3 = vcmp.eq.f32.partialorder %v498_v23, %v500_v26  ;;  %v506_v29 = vcvt.f32.s32 %v500_v26 }
 0x5ef   : >> { %v502_v28 = vsel %vm501_vm3, %v497_v27, inf }
 0x5f0   : >> { %503 = vmin.xlane.f32.xlu0 %v502_v28  ;;  %v507_v31 = vshll.u32 %v506_v29, 16 }
 0x67d   : >> { %v504_v30 = vpop.xlane.xlu0 %503 }
 0x67e   : >> { %v505_v32 = vcvt.f32.s32 %v504_v30 }
 0x680   : >> { %v508_v33 = vadd.s32 %v507_v31, %v505_v32 }
 0x682   : >> { %vm510_vm4 = vcmp.eq.s32.totalorder %v486_v18, %v508_v33  ;;  %vm512_vm5 = vcmp.eq.s32.totalorder %v488_v7, %v508_v33  ;;  %vm509_vm6 = vcmp.eq.s32.totalorder %v485_v10, %v508_v33  ;;  %vm511_vm7 = vcmp.eq.s32.totalorder %v487_v19, %v508_v33 }
 0x683   : >> { %v514_v34 = vsel %vm510_vm4, 2147483647, %v486_v18  ;;  %874 = vmatprep.mubr.msk.f32.mxu0 %vm510_vm4, %v1083_v4  ;;  %v516_v35 = vsel %vm512_vm5, 2147483647, %v488_v7  ;;  %882 = vmatprep.mubr.msk.f32.mxu1 %vm512_vm5, %v1083_v4  ;;  %v513_v36 = vsel %vm509_vm6, 2147483647, %v485_v10 }
 0x684   : >> { %875 = vmatmul.mubr.msk.f32.gmra.mrb[4].mxu0 %vm509_vm6, %v1083_v4  ;;  %v515_v37 = vsel %vm511_vm7, 2147483647, %v487_v19  ;;  %883 = vmatmul.mubr.msk.f32.gmra.mrb[4].mxu1 %vm511_vm7, %v1083_v4  ;;  %vm517_vm8 = vcmp.lt.s32.totalorder %v513_v36, %v514_v34 }
 0x685   : >> { %v518_v38 = vsel %vm517_vm8, %v513_v36, %v514_v34  ;;  %vm519_vm9 = vcmp.lt.s32.totalorder %v515_v37, %v516_v35  ;;  %vm775_vm8 = vcmask 523264  }
 0x686   : >> { %v520_v39 = vsel %vm519_vm9, %v515_v37, %v516_v35 }
 0x687   : >> { %vm521_vm10 = vcmp.lt.s32.totalorder %v518_v38, %v520_v39 }
 0x688   : >> { %v522_v40 = vsel %vm521_vm10, %v518_v38, %v520_v39 }
 0x689   : >> { %v524_v41 = vshra.s32 %v522_v40, 16  ;;  %v523_v43 = vand.u32 65535, %v522_v40 }
 0x68b   : >> { %v526_v42 = vcvt.s32.f32 %v524_v41  ;;  %v525_v45 = vcvt.s32.f32 %v523_v43 }
 0x68d   : >> { %527 = vmin.xlane.f32.xlu1 %v526_v42 }
 0x71a   : >> { %v528_v44 = vpop.xlane.xlu1 %527 }
 0x71b   : >> { %vm529_vm11 = vcmp.eq.f32.partialorder %v526_v42, %v528_v44  ;;  %v534_v53 = vcvt.f32.s32 %v528_v44 }
 0x71c   : >> { %v530_v46 = vsel %vm529_vm11, %v525_v45, inf }
 0x71d   : >> { %531 = vmin.xlane.f32.xlu0 %v530_v46  ;;  %v535_v55 = vshll.u32 %v534_v53, 16 }
 0x757   : >> { %v926_v47 = vpop.f32.mrb[4].mxu0  ;;  %v970_v48 = vpop.f32.mrb[4].mxu1 }
 0x758   : >> { %v927_v49 = vpop.f32.mrb[5].mxu0  ;;  %v971_v50 = vpop.f32.mrb[5].mxu1 }
 0x759   : >> { %v928_v51 = vadd.f32 %v927_v49, %v926_v47  ;;  %v972_v52 = vadd.f32 %v971_v50, %v970_v48 }
 0x75b   : >> { %v763_v13 = vadd.f32 %v972_v52, %v928_v51 }
 0x75d   : >> { %v772_v15 = vmax.f32 %v771_v11, %v763_v13 }
 0x7aa   : >> { %v532_v54 = vpop.xlane.xlu0 %531 }
 0x7ab   : >> { %v533_v56 = vcvt.f32.s32 %v532_v54 }
 0x7ad   : >> { %v536_v57 = vadd.s32 %v535_v55, %v533_v56 }
 0x7af   : >> { %vm537_vm12 = vcmp.eq.s32.totalorder %v513_v36, %v536_v57  ;;  %vm538_vm13 = vcmp.eq.s32.totalorder %v514_v34, %v536_v57  ;;  %vm539_vm14 = vcmp.eq.s32.totalorder %v515_v37, %v536_v57  ;;  %vm540_vm15 = vcmp.eq.s32.totalorder %v516_v35, %v536_v57 }
 0x7b0   : >> { %v541_v58 = vsel %vm537_vm12, 2147483647, %v513_v36  ;;  %v542_v59 = vsel %vm538_vm13, 2147483647, %v514_v34  ;;  %v543_v60 = vsel %vm539_vm14, 2147483647, %v515_v37 }
 0x7b1   : >> { %v544_v61 = vsel %vm540_vm15, 2147483647, %v516_v35  ;;  %vm545_vm0 = vcmp.lt.s32.totalorder %v541_v58, %v542_v59 }
 0x7b2   : >> { %v546_v62 = vsel %vm545_vm0, %v541_v58, %v542_v59  ;;  %vm547_vm1 = vcmp.lt.s32.totalorder %v543_v60, %v544_v61 }
 0x7b3   : >> { %v548_v63 = vsel %vm547_vm1, %v543_v60, %v544_v61 }
 0x7b4   : >> { %vm549_vm2 = vcmp.lt.s32.totalorder %v546_v62, %v548_v63 }
 0x7b5   : >> { %v550_v25 = vsel %vm549_vm2, %v546_v62, %v548_v63 }
 0x7b6   : >> { %v552_v3 = vshra.s32 %v550_v25, 16  ;;  %v551_v6 = vand.u32 65535, %v550_v25 }
 0x7b8   : >> { %v554_v5 = vcvt.s32.f32 %v552_v3  ;;  %v553_v12 = vcvt.s32.f32 %v551_v6 }
 0x7ba   : >> { %555 = vmin.xlane.f32.xlu1 %v554_v5 }
 0x847   : >> { %v556_v11 = vpop.xlane.xlu1 %555 }
 0x848   : >> { %vm557_vm3 = vcmp.eq.f32.partialorder %v554_v5, %v556_v11  ;;  %v562_v8 = vcvt.f32.s32 %v556_v11 }
 0x849   : >> { %v558_v14 = vsel %vm557_vm3, %v553_v12, inf }
 0x84a   : >> { %559 = vmin.xlane.f32.xlu0 %v558_v14  ;;  %v563_v17 = vshll.u32 %v562_v8, 16 }
 0x8d7   : >> { %v560_v16 = vpop.xlane.xlu0 %559 }
 0x8d8   : >> { %v561_v10 = vcvt.f32.s32 %v560_v16 }
 0x8da   : >> { %v564_v18 = vadd.s32 %v563_v17, %v561_v10 }
 0x8dc   : >> { %vm566_vm4 = vcmp.eq.s32.totalorder %v542_v59, %v564_v18  ;;  %vm568_vm5 = vcmp.eq.s32.totalorder %v544_v61, %v564_v18  ;;  %vm565_vm6 = vcmp.eq.s32.totalorder %v541_v58, %v564_v18  ;;  %vm567_vm7 = vcmp.eq.s32.totalorder %v543_v60, %v564_v18 }
 0x8dd   : >> { %876 = vmatprep.mubr.msk.f32.mxu0 %vm566_vm4, %v1083_v4  ;;  %884 = vmatprep.mubr.msk.f32.mxu1 %vm568_vm5, %v1083_v4 }
 0x8de   : >> { %877 = vmatmul.mubr.msk.f32.gmra.mrb[6].mxu0 %vm565_vm6, %v1083_v4  ;;  %885 = vmatmul.mubr.msk.f32.gmra.mrb[6].mxu1 %vm567_vm7, %v1083_v4 }
 0x9b1   : >> { %v929_v19 = vpop.f32.mrb[6].mxu0  ;;  %v973_v7 = vpop.f32.mrb[6].mxu1 }
 0x9b2   : >> { %v930_v20 = vpop.f32.mrb[7].mxu0  ;;  %v974_v21 = vpop.f32.mrb[7].mxu1 }
 0x9b3   : >> { %v931_v9 = vadd.f32 %v930_v20, %v929_v19  ;;  %v975_v22 = vadd.f32 %v974_v21, %v973_v7  ;;  %183 = sbr.rel (!%p181_p4) target bundleno = 16 (0x10), region = 73 }
 0x9b5   : >> { %v768_v23 = vadd.f32 %v975_v22, %v931_v9 }
 0x9b7   : >> { %v773_v24 = vmax.f32 %v772_v15, %v768_v23 }
 0x9b9   : >> { %776 = vst.msk [vmem:[%s774_s23] sm:$0xff] %vm775_vm8, %v773_v24 }
 0x9ba PF: > { %s13_s12 = sadd.s32 1, %s1074_s12  }
 0x9bb   : > { %p10_p5 = scmp.ge.s32.totalorder %s13_s12, 4  }
 0x9bd   :  { %12 = sbr.rel (!%p10_p5) target bundleno = 1 (0x1), region = 84 }

</bundles_post_ra>
